<compile_context>
chip_gen: v7x
topology: tpu7x:2x2x1
jax: 0.10.0
libtpu: 0.0.40
codegen_flags: <defaults>
</compile_context>

<pallas_src>
import jax
import jax.numpy as jnp
from jax.experimental import pallas as pl
from jax.experimental.pallas import tpu as pltpu


def _nntest_multi_kernel(wb_ref, x_ref, o1_ref, o2_ref):
    """wb_ref: (2, 3, 4) packed weights; x_ref: (1, 3, TL) pixel tile.

    wb_ref[i, :, :3] is the folded 3x3 channel mix of branch i,
    wb_ref[i, :, 3]  is the folded bias of branch i.
    """
    x = x_ref[0]                                   # (3, TL)  pixels on lanes
    wb1 = wb_ref[0]                                # (3, 4)
    wb2 = wb_ref[1]                                # (3, 4)

    y1 = jnp.dot(wb1[:, :3], x, preferred_element_type=jnp.float32) + wb1[:, 3:4]
    y2 = jnp.dot(wb2[:, :3], x, preferred_element_type=jnp.float32) + wb2[:, 3:4]

    o1_ref[0] = y1.astype(o1_ref.dtype)
    o2_ref[0] = y2.astype(o2_ref.dtype)


def _pick_lane_tile(L, requested):
    """Largest multiple-of-128 divisor of L that is <= requested, else L."""
    if L <= requested:
        return L
    t = (requested // 128) * 128
    while t >= 128:
        if L % t == 0:
            return t
        t -= 128
    # TODO(synk): pad L to a multiple of 128 for ragged spatial sizes instead
    # of falling back to a single full-row block.
    return L


def nntest_multi_forward(x_nchw, params, *, tile_l=8192):
    """Runs both conv branches. x_nchw: (N, 3, H, W) float32.

    Returns (y1, y2), each (N, 3, H, W) float32.
    """
    (w1, b1, w2, b2, w3, b3, w4, b4) = params
    N, C, H, W = x_nchw.shape
    assert C == 3
    L = H * W

    # Free reshape: NCHW -> (N, C, L). Pixels land on the lane axis.
    x3 = x_nchw.reshape(N, C, L)

    # Fold each branch: y = W2 @ (W1 @ x + b1) + b2 = (W2@W1) @ x + (W2@b1 + b2)
    def fold(wa, ba, wb_, bb):
        Wa = wa[:, :, 0, 0]            # (6, 3)
        Wb = wb_[:, :, 0, 0]           # (3, 6)
        w_eff = Wb @ Wa                # (3, 3)
        b_eff = Wb @ ba + bb           # (3,)
        return jnp.concatenate([w_eff, b_eff[:, None]], axis=1)   # (3, 4)

    wb_packed = jnp.stack([fold(w1, b1, w2, b2),
                           fold(w3, b3, w4, b4)], axis=0)          # (2, 3, 4)

    tl = _pick_lane_tile(L, tile_l)
    assert L % tl == 0
    grid = (N, L // tl)

    out_shape = (
        jax.ShapeDtypeStruct((N, 3, L), jnp.float32),
        jax.ShapeDtypeStruct((N, 3, L), jnp.float32),
    )

    y1_flat, y2_flat = pl.pallas_call(
        _nntest_multi_kernel,
        out_shape=out_shape,
        grid_spec=pltpu.PrefetchScalarGridSpec(
            num_scalar_prefetch=0,
            grid=grid,
            in_specs=[
                # Tiny packed weight/bias block, resident across the grid.
                pl.BlockSpec((2, 3, 4), lambda n, l: (0, 0, 0)),
                # Lane-dense pixel tile.
                pl.BlockSpec((1, 3, tl), lambda n, l: (n, 0, l)),
            ],
            out_specs=[
                pl.BlockSpec((1, 3, tl), lambda n, l: (n, 0, l)),
                pl.BlockSpec((1, 3, tl), lambda n, l: (n, 0, l)),
            ],
        ),
        compiler_params=pltpu.CompilerParams(
            dimension_semantics=("parallel", "parallel")),
    )(wb_packed, x3)

    # Free reshapes back to NCHW.
    return y1_flat.reshape(N, 3, H, W), y2_flat.reshape(N, 3, H, W)


def init_params(key):
    """Deterministic init matching the Conv2d shapes in NNTestMulti.__init__."""
    ks = jax.random.split(key, 8)

    def conv_init(kw, kb, cout, cin):
        # PyTorch default: uniform(-1/sqrt(fan_in), 1/sqrt(fan_in)), fan_in = cin*1*1
        bound = 1.0 / jnp.sqrt(jnp.float32(cin))
        w = jax.random.uniform(kw, (cout, cin, 1, 1), jnp.float32, -bound, bound)
        b = jax.random.uniform(kb, (cout,), jnp.float32, -bound, bound)
        return w, b

    w1, b1 = conv_init(ks[0], ks[1], 6, 3)   # model[0]:  Conv2d(3, 6, 1x1)
    w2, b2 = conv_init(ks[2], ks[3], 3, 6)   # model[1]:  Conv2d(6, 3, 1x1)
    w3, b3 = conv_init(ks[4], ks[5], 6, 3)   # model2[0]: Conv2d(3, 6, 1x1)
    w4, b4 = conv_init(ks[6], ks[7], 3, 6)   # model2[1]: Conv2d(6, 3, 1x1)
    return (w1, b1, w2, b2, w3, b3, w4, b4)


def _reference(x_nchw, params):
    """Pure-JAX reference (un-folded 1x1 convs) for a correctness check."""
    (w1, b1, w2, b2, w3, b3, w4, b4) = params

    def conv1x1(x, w, b):
        y = jnp.einsum('nchw,oc->nohw', x, w[:, :, 0, 0])
        return y + b[None, :, None, None]

    y1 = conv1x1(conv1x1(x_nchw, w1, b1), w2, b2)
    y2 = conv1x1(conv1x1(x_nchw, w3, b3), w4, b4)
    return y1, y2


if __name__ == "__main__":
    key = jax.random.PRNGKey(0)
    kx, kp = jax.random.split(key)

    # Small NCHW input consistent with Conv2d(3, ...): batch=2, C=3, 16x16 spatial.
    x = jax.random.normal(kx, (2, 3, 16, 16), dtype=jnp.float32)
    params = init_params(kp)

    y1, y2 = nntest_multi_forward(x, params)
    jax.block_until_ready((y1, y2))

    r1, r2 = _reference(x, params)
    assert y1.shape == (2, 3, 16, 16) and y2.shape == (2, 3, 16, 16)
    assert jnp.allclose(y1, r1, atol=1e-5, rtol=1e-5)
    assert jnp.allclose(y2, r2, atol=1e-5, rtol=1e-5)

    print("KERNEL_OK")
</pallas_src>

<mosaic_0001>
module attributes {stable_mosaic.version = 11 : i64} {
  func.func @_nntest_multi_kernel(%arg0: i32, %arg1: i32, %arg2: memref<2x3x4xf32, #tpu.memory_space<vmem>>, %arg3: memref<1x3x256xf32, #tpu.memory_space<vmem>>, %arg4: memref<1x3x256xf32, #tpu.memory_space<vmem>>, %arg5: memref<1x3x256xf32, #tpu.memory_space<vmem>>) attributes {dimension_semantics = [#tpu.dimension_semantics<parallel>, #tpu.dimension_semantics<parallel>], iteration_bounds = array<i64: 2, 1>, scalar_prefetch = 0 : i64, scratch_operands = 0 : i64, tpu.core_type = #tpu.core_type<tc>, window_params = [{pipeline_mode = #tpu.pipeline_mode<synchronous>, transform_indices = @transform_0, window_bounds = array<i64: 2, 3, 4>}, {transform_indices = @transform_1, window_bounds = array<i64: 1, 3, 256>}, {transform_indices = @transform_2, window_bounds = array<i64: 1, 3, 256>}, {transform_indices = @transform_3, window_bounds = array<i64: 1, 3, 256>}]} {
    %c0 = arith.constant 0 : index
    %c0_0 = arith.constant 0 : index
    %c0_1 = arith.constant 0 : index
    %0 = vector.load %arg3[%c0, %c0_0, %c0_1] : memref<1x3x256xf32, #tpu.memory_space<vmem>>, vector<1x3x256xf32>
    %1 = vector.shape_cast %0 : vector<1x3x256xf32> to vector<3x256xf32>
    %c0_2 = arith.constant 0 : index
    %c0_3 = arith.constant 0 : index
    %c0_4 = arith.constant 0 : index
    %2 = vector.load %arg2[%c0_2, %c0_3, %c0_4] : memref<2x3x4xf32, #tpu.memory_space<vmem>>, vector<1x3x4xf32>
    %3 = vector.shape_cast %2 : vector<1x3x4xf32> to vector<3x4xf32>
    %c1 = arith.constant 1 : index
    %c0_5 = arith.constant 0 : index
    %c0_6 = arith.constant 0 : index
    %4 = vector.load %arg2[%c1, %c0_5, %c0_6] : memref<2x3x4xf32, #tpu.memory_space<vmem>>, vector<1x3x4xf32>
    %5 = vector.shape_cast %4 : vector<1x3x4xf32> to vector<3x4xf32>
    %6 = vector.extract_strided_slice %3 {offsets = [0, 0], sizes = [3, 3], strides = [1, 1]} : vector<3x4xf32> to vector<3x3xf32>
    %cst = arith.constant dense<0.000000e+00> : vector<3x256xf32>
    %7 = tpu.matmul %6, %1, %cst {dimension_numbers = #tpu.dot_dimension_numbers<[1], [0], [0], [1], [0, 0, 1, 1], [], []>} : vector<3x3xf32>, vector<3x256xf32>, vector<3x256xf32> -> vector<3x256xf32>
    %8 = vector.extract_strided_slice %3 {offsets = [0, 3], sizes = [3, 1], strides = [1, 1]} : vector<3x4xf32> to vector<3x1xf32>
    %9 = vector.broadcast %8 : vector<3x1xf32> to vector<3x256xf32>
    %10 = arith.addf %7, %9 : vector<3x256xf32>
    %11 = vector.extract_strided_slice %5 {offsets = [0, 0], sizes = [3, 3], strides = [1, 1]} : vector<3x4xf32> to vector<3x3xf32>
    %cst_7 = arith.constant dense<0.000000e+00> : vector<3x256xf32>
    %12 = tpu.matmul %11, %1, %cst_7 {dimension_numbers = #tpu.dot_dimension_numbers<[1], [0], [0], [1], [0, 0, 1, 1], [], []>} : vector<3x3xf32>, vector<3x256xf32>, vector<3x256xf32> -> vector<3x256xf32>
    %13 = vector.extract_strided_slice %5 {offsets = [0, 3], sizes = [3, 1], strides = [1, 1]} : vector<3x4xf32> to vector<3x1xf32>
    %14 = vector.broadcast %13 : vector<3x1xf32> to vector<3x256xf32>
    %15 = arith.addf %12, %14 : vector<3x256xf32>
    %c0_8 = arith.constant 0 : index
    %c0_9 = arith.constant 0 : index
    %c0_10 = arith.constant 0 : index
    %16 = vector.load %arg4[%c0_8, %c0_9, %c0_10] : memref<1x3x256xf32, #tpu.memory_space<vmem>>, vector<1x3x256xf32>
    %17 = vector.shape_cast %16 : vector<1x3x256xf32> to vector<3x256xf32>
    %18 = vector.shape_cast %10 : vector<3x256xf32> to vector<1x3x256xf32>
    tpu.vector_store %arg4[%c0_8, %c0_9, %c0_10], %18 {strides = array<i32>} : memref<1x3x256xf32, #tpu.memory_space<vmem>>, vector<1x3x256xf32>,
    %c0_11 = arith.constant 0 : index
    %c0_12 = arith.constant 0 : index
    %c0_13 = arith.constant 0 : index
    %19 = vector.load %arg5[%c0_11, %c0_12, %c0_13] : memref<1x3x256xf32, #tpu.memory_space<vmem>>, vector<1x3x256xf32>
    %20 = vector.shape_cast %19 : vector<1x3x256xf32> to vector<3x256xf32>
    %21 = vector.shape_cast %15 : vector<3x256xf32> to vector<1x3x256xf32>
    tpu.vector_store %arg5[%c0_11, %c0_12, %c0_13], %21 {strides = array<i32>} : memref<1x3x256xf32, #tpu.memory_space<vmem>>, vector<1x3x256xf32>,
    return
  }
  func.func @transform_0(%arg0: i32, %arg1: i32) -> (i32, i32, i32) {
    %c0_i32 = arith.constant 0 : i32
    %c0_i32_0 = arith.constant 0 : i32
    %c0_i32_1 = arith.constant 0 : i32
    %c0_i32_2 = arith.constant 0 : i32
    return %c0_i32, %c0_i32_0, %c0_i32_1 : i32, i32, i32
  }
  func.func @transform_1(%arg0: i32, %arg1: i32) -> (i32, i32, i32) {
    %c0_i32 = arith.constant 0 : i32
    %c0_i32_0 = arith.constant 0 : i32
    return %arg0, %c0_i32, %arg1 : i32, i32, i32
  }
  func.func @transform_2(%arg0: i32, %arg1: i32) -> (i32, i32, i32) {
    %c0_i32 = arith.constant 0 : i32
    %c0_i32_0 = arith.constant 0 : i32
    return %arg0, %c0_i32, %arg1 : i32, i32, i32
  }
  func.func @transform_3(%arg0: i32, %arg1: i32) -> (i32, i32, i32) {
    %c0_i32 = arith.constant 0 : i32
    %c0_i32_0 = arith.constant 0 : i32
    return %arg0, %c0_i32, %arg1 : i32, i32, i32
  }
}

</mosaic_0001>

<bundles_post_ra>
// kernel: tpu_custom_call.1
= control target key start
LH: loop header
LB: loop body
LE: loop exit
PB: predicated region body
PF: predicated region fallthrough
CT: control target
= control target key end

     0   :  { %s646_s12 = smov 0   ;;  %s648_s13 = smov 0   ;;  %s693_s0 = inlined_call_operand.vmem [shape: f32[2,3,4], index: 0, kind: input, shape index: {}]   ;;  %s694_s1 = inlined_call_operand.vmem [shape: f32[2,3,256], index: 1, kind: input, shape index: {}]   ;;  %s695_s2 = inlined_call_operand.vmem [shape: f32[2,3,256], index: 2, kind: output, shape index: {0}]   ;;  %s696_s3 = inlined_call_operand.vmem [shape: f32[2,3,256], index: 3, kind: output, shape index: {1}]  }
   0x1   :  { %s650_s14 = smov 0  }
   0x2 LB: > { %s26_s15 = sadd.s32 1, %s618_s13  ;;  %p553_p0 = scmp.ge.s32.totalorder %s622_s14, 1  ;;  %s622_s14 = sphi %s650_s14, %s14_s14   ;;  %s618_s13 = sphi %s648_s13, %s698_s13   ;;  %s614_s12 = sphi %s646_s12, %s697_s12  }
   0x3   : > { %p28_p1 = scmp.ge.s32.totalorder %s26_s15, 2  ;;  %p163_p2 = scmp.lt.s32.totalorder %s622_s14, 3 }
   0x5   : > { %s700_s15 = smov (%p28_p1, %s26_s15), 0  ;;  %p164_p3 = pnand %p553_p0, %p163_p2 }
   0x6   : > { %p205_p4 = scmp.lt.s32.totalorder (!%p164_p3), %s614_s12, 1  ;;  %v624_v0 = vmov (!%p164_p3), 0.0   ;;  %v235_v1 = vld [vmem:[%s693_s0] sm:$0x7] (!%p164_p3)  ;;  %v625_v2 = vmov (!%p164_p3), 3   ;;  %vm248_vm0 = vcmask (!%p164_p3), 1042432  }
   0x7   : > { %167 = sbr.rel (%p164_p3) target bundleno = 240 (0xf0), region = 28  ;;  %317 = vmatprep.mubr.f32.mxu0 (!%p164_p3), %v624_v0  ;;  %395 = vmatprep.mubr.f32.mxu1 (!%p164_p3), %v624_v0  ;;  %v560_v4 = vld [vmem:[%s693_s0 + $0x4] sm:$0x7] (!%p164_p3)  ;;  %vm245_vm1 = vcmask (!%p164_p3), 23552  }
   0x8   : > { %598 = vset.pattern.permute.xlu0 (!%p164_p3), %v625_v2 }
   0x9   : > { %240 = vperm.xlu0 (!%p164_p3), %598, %v235_v1  }
   0xd   : > { %326 = vperm.xlu0 (!%p164_p3), %598, %v560_v4  }
   0xe   : > { %s702_s12 = smov (!%p205_p4, %s614_s12), 1 }
   0xf   : > { %s667_s18 = sshll.u32 %s702_s12, 3 }
  0x10   : > { %s212_s21 = scalar_lea.vmem %s694_s1, %s667_s18  ;;  %s222_s26 = scalar_lea.vmem %s695_s2, %s667_s18 }
  0x11   : > { %v234_v3 = vld [vmem:[%s212_s21] sm:$0x77]  ;;  %s232_s29 = scalar_lea.vmem %s696_s3, %s667_s18 }
  0x12   : > { %v244_v5 = vcombine.high %v234_v3, %v234_v3 }
  0x14   : > { %561 = vmatprep.subr.msk.mxu0 %vm248_vm0, %v244_v5  ;;  %564 = vmatprep.subr.msk.mxu1 %vm248_vm0, %v244_v5 }
  0x15   : > { %562 = vmatpush1.msk.msra.mxu0 %vm248_vm0, %v234_v3  ;;  %565 = vmatpush1.msk.msra.mxu1 %vm248_vm0, %v234_v3 }
  0x16   : > { %563 = vmatmul.mubr.msk.f32.vlgmr.msra.gmra.mrb[0].mxu0 %vm245_vm1, %v235_v1  ;;  %566 = vmatmul.mubr.msk.f32.vlgmr.msra.gmra.mrb[0].mxu1 %vm245_vm1, %v560_v4 }
  0x88   : > { %v241_v6 = vpop.permute.xlu0 %240 }
  0x8c   : > { %v327_v7 = vpop.permute.xlu0 %326 }
  0xe9   : > { %v319_v8 = vpop.f32.mrb[0].mxu0  ;;  %v397_v9 = vpop.f32.mrb[0].mxu1 }
  0xea   : > { %v320_v10 = vadd.f32 %v319_v8, %v241_v6  ;;  %v398_v11 = vadd.f32 %v397_v9, %v327_v7  ;;  %v321_v12 = vpop.f32.mrb[1].mxu0  ;;  %v399_v13 = vpop.f32.mrb[1].mxu1 }
  0xeb   : > { %v322_v14 = vadd.f32 %v321_v12, %v241_v6  ;;  %v400_v15 = vadd.f32 %v399_v13, %v327_v7 }
  0xed   : > { %v404_v16 = vcombine.low %v320_v10, %v322_v14  ;;  %v409_v17 = vcombine.low %v398_v11, %v400_v15 }
  0xef   : > { %406 = vst [vmem:[%s222_s26] sm:$0x77] %v404_v16  ;;  %411 = vst [vmem:[%s232_s29] sm:$0x77] %v409_v17 }
  0xf0 PF: > { %s14_s14 = sadd.s32 1, %s622_s14   ;;  %s697_s12 = smov %s618_s13 }
  0xf1   : > { %p11_p5 = scmp.ge.s32.totalorder %s14_s14, 4   ;;  %s698_s13 = smov %s700_s15 }
  0xf3   :  { %13 = sbr.rel (!%p11_p5) target bundleno = 2 (0x2), region = 71 }

</bundles_post_ra>
